<compile_context>
chip_gen: v6e
topology: v6e:2x2x1
jax: 0.10.0
libtpu: 0.0.40
codegen_flags: <defaults>
</compile_context>

<pallas_src>
import jax
import jax.numpy as jnp
from jax.experimental import pallas as pl
from jax.experimental.pallas import tpu as pltpu


HIDDEN = (64, 64)


def _round_up(x, m):
    return ((x + m - 1) // m) * m


def _batch_tile(B):
    """Pick the batch tile (the lane axis inside the kernel).

    Small batches: one grid step (block == full dim, so the (8,128) rule is
    trivially satisfied and v5e/v6e's single TensorCore sees zero extra
    per-step overhead).  B >= 256: two multiple-of-128 tiles so the
    ("parallel",) batch axis can shard across v7x's two TensorCores; any
    partial trailing block is handled by Pallas (masked edge stores, and
    padded-lane garbage never leaks into valid columns since every op here
    is per-batch-column).
    """
    if B >= 256:
        b_tile = _round_up(pl.cdiv(B, 2), 128)
    else:
        b_tile = B
    return b_tile, pl.cdiv(B, b_tile)


def _mlp_body(x, w1, b1, w2, b2, w3, b3):
    """Feature-major MLP: x is (in_features, b_tile), batch on the lane axis.

    Weights are PyTorch nn.Linear layout (out, in); biases (out, 1).
    MXU operands cast to bf16 (native on every generation's MXU); f32
    accumulation; bias add + tanh stay f32 (v5e has no bf16 VPU/EUP).
    K=4 / M=2 MXU under-utilization in layers 1/3 is intentionally ignored:
    the kernel is launch/DMA bound, not MXU bound.
    """
    bf = lambda a: a.astype(jnp.bfloat16)
    h1 = jnp.tanh(jnp.dot(bf(w1), bf(x), preferred_element_type=jnp.float32) + b1)
    h2 = jnp.tanh(jnp.dot(bf(w2), bf(h1), preferred_element_type=jnp.float32) + b2)
    return jnp.dot(bf(w3), bf(h2), preferred_element_type=jnp.float32) + b3


def _masked_q(q, act_ids):
    """One-hot select of the chosen action's Q value per batch column."""
    row_ids = jax.lax.broadcasted_iota(jnp.int32, q.shape, 0)
    return jnp.sum(jnp.where(row_ids == act_ids, q, 0.0), axis=0, keepdims=True)


# ---------------------------------------------------------------------------
# Kernels
# ---------------------------------------------------------------------------

def q_mlp_kernel(x_ref, w1_ref, b1_ref, w2_ref, b2_ref, w3_ref, b3_ref, o_ref):
    x = x_ref[...].T                            # (obs_size, b_tile): batch->lanes
    o_ref[...] = _mlp_body(x, w1_ref[...], b1_ref[...], w2_ref[...],
                           b2_ref[...], w3_ref[...], b3_ref[...])


def q_mask_kernel(x_ref, act_ref, w1_ref, b1_ref, w2_ref, b2_ref, w3_ref,
                  b3_ref, o_ref):
    """Fused Q.forward_mask: MLP + per-column action gather, all in-kernel."""
    q = _mlp_body(x_ref[...].T, w1_ref[...], b1_ref[...], w2_ref[...],
                  b2_ref[...], w3_ref[...], b3_ref[...])
    o_ref[...] = _masked_q(q, act_ref[...])     # (1, b_tile)


def q_train_kernel(x_ref, nx_ref, act_ref,
                   w1_ref, b1_ref, w2_ref, b2_ref, w3_ref, b3_ref,
                   tw1_ref, tb1_ref, tw2_ref, tb2_ref, tw3_ref, tb3_ref,
                   qsa_ref, qmax_ref):
    """Fused DQN step targets in one launch: q(s,a) and max_a q_target(s')."""
    q = _mlp_body(x_ref[...].T, w1_ref[...], b1_ref[...], w2_ref[...],
                  b2_ref[...], w3_ref[...], b3_ref[...])
    qsa_ref[...] = _masked_q(q, act_ref[...])
    qt = _mlp_body(nx_ref[...].T, tw1_ref[...], tb1_ref[...], tw2_ref[...],
                   tb2_ref[...], tw3_ref[...], tb3_ref[...])
    qmax_ref[...] = jnp.max(qt, axis=0, keepdims=True)


# ---------------------------------------------------------------------------
# Wrappers
# ---------------------------------------------------------------------------

def _param_list(params):
    return [params[k] for k in ("w1", "b1", "w2", "b2", "w3", "b3")]


def _wspec(a):
    # Constant index_map -> Pallas DMAs the block once and keeps it
    # VMEM-resident across grid steps.  (pl.Buffered(1) would also drop the
    # unused second buffer, ~18 KiB; skipped as pure hygiene.)
    return pl.BlockSpec(a.shape, lambda i: (0, 0))


def _cost(B, obs_size, act_size, n_mlps, out_rows, has_act_ids):
    flops = n_mlps * 2 * B * (obs_size * HIDDEN[0] + HIDDEN[0] * HIDDEN[1]
                              + HIDDEN[1] * act_size)
    transcendentals = n_mlps * (HIDDEN[0] + HIDDEN[1]) * B
    param_elems = (obs_size * HIDDEN[0] + HIDDEN[0]
                   + HIDDEN[0] * HIDDEN[1] + HIDDEN[1]
                   + HIDDEN[1] * act_size + act_size)
    bytes_accessed = 4 * (n_mlps * (obs_size * B + param_elems)
                          + out_rows * B + (B if has_act_ids else 0))
    return pl.CostEstimate(flops=flops, transcendentals=transcendentals,
                           bytes_accessed=bytes_accessed)


def q_forward(obs, params):
    """Q.forward: obs (B, obs_size) f32 -> Q-values (B, act_size) f32."""
    w1, b1, w2, b2, w3, b3 = _param_list(params)
    B, obs_size = obs.shape
    act_size = w3.shape[0]
    b_tile, n_blocks = _batch_tile(B)

    out_t = pl.pallas_call(
        q_mlp_kernel,
        out_shape=jax.ShapeDtypeStruct((act_size, B), jnp.float32),
        grid=(n_blocks,),
        in_specs=[pl.BlockSpec((b_tile, obs_size), lambda i: (i, 0))]
                 + [_wspec(p) for p in (w1, b1, w2, b2, w3, b3)],
        out_specs=pl.BlockSpec((act_size, b_tile), lambda i: (0, i)),
        compiler_params=pltpu.CompilerParams(
            dimension_semantics=("parallel",)),
        cost_estimate=_cost(B, obs_size, act_size, 1, act_size, False),
    )(obs, w1, b1, w2, b2, w3, b3)

    # Only remaining wrapper op: tiny (act_size, B) -> (B, act_size) transpose
    # to match the torch-facing layout.  Downstream code that is happy with
    # feature-major output can use out_t directly.
    return out_t.T


def q_forward_mask(obs, act, params):
    """Q.forward_mask: Q-value of the chosen action per row -> (B,) f32."""
    w1, b1, w2, b2, w3, b3 = _param_list(params)
    B, obs_size = obs.shape
    act_size = w3.shape[0]
    b_tile, n_blocks = _batch_tile(B)
    act_row = act.astype(jnp.int32).reshape(1, B)   # lane-major action ids

    out = pl.pallas_call(
        q_mask_kernel,
        out_shape=jax.ShapeDtypeStruct((1, B), jnp.float32),
        grid=(n_blocks,),
        in_specs=[pl.BlockSpec((b_tile, obs_size), lambda i: (i, 0)),
                  pl.BlockSpec((1, b_tile), lambda i: (0, i))]
                 + [_wspec(p) for p in (w1, b1, w2, b2, w3, b3)],
        out_specs=pl.BlockSpec((1, b_tile), lambda i: (0, i)),
        compiler_params=pltpu.CompilerParams(
            dimension_semantics=("parallel",)),
        cost_estimate=_cost(B, obs_size, act_size, 1, 1, True),
    )(obs, act_row, w1, b1, w2, b2, w3, b3)

    return out[0]


def q_train_targets(obs, act, next_obs, params, target_params):
    """Fused DQN hot path: one launch for q(s,a) and max_a q_target(s').

    Returns (q_sa, q_next_max), each (B,) f32.  Replaces the separate
    forward_mask(online net) + forward(target net).max(-1) calls of a
    training step with a single pallas_call (one launch, one weight DMA).
    """
    w = _param_list(params)
    tw = _param_list(target_params)
    B, obs_size = obs.shape
    act_size = w[4].shape[0]
    b_tile, n_blocks = _batch_tile(B)
    act_row = act.astype(jnp.int32).reshape(1, B)

    obs_spec = pl.BlockSpec((b_tile, obs_size), lambda i: (i, 0))
    lane_spec = pl.BlockSpec((1, b_tile), lambda i: (0, i))

    q_sa, q_next_max = pl.pallas_call(
        q_train_kernel,
        out_shape=(jax.ShapeDtypeStruct((1, B), jnp.float32),
                   jax.ShapeDtypeStruct((1, B), jnp.float32)),
        grid=(n_blocks,),
        in_specs=[obs_spec, obs_spec, lane_spec]
                 + [_wspec(p) for p in w] + [_wspec(p) for p in tw],
        out_specs=(lane_spec, lane_spec),
        compiler_params=pltpu.CompilerParams(
            dimension_semantics=("parallel",)),
        cost_estimate=_cost(B, obs_size, act_size, 2, 2, True),
    )(obs, next_obs, act_row, *w, *tw)

    return q_sa[0], q_next_max[0]


# ---------------------------------------------------------------------------
# Params / reference
# ---------------------------------------------------------------------------

def init_params(key, obs_size, act_size, hidden=HIDDEN):
    """nn.Linear-style init (uniform +-1/sqrt(fan_in)).

    Weights in PyTorch layout (out_features, in_features); biases as
    (out_features, 1) so they broadcast along the lane/batch axis in-kernel."""
    sizes = [obs_size] + list(hidden) + [act_size]
    params = {}
    for j in range(len(sizes) - 1):
        fan_in, fan_out = sizes[j], sizes[j + 1]
        key, kw, kb = jax.random.split(key, 3)
        bound = 1.0 / jnp.sqrt(fan_in)
        params[f"w{j + 1}"] = jax.random.uniform(
            kw, (fan_out, fan_in), jnp.float32, -bound, bound)
        params[f"b{j + 1}"] = jax.random.uniform(
            kb, (fan_out, 1), jnp.float32, -bound, bound)
    return params


def q_forward_ref(obs, params):
    """Pure-JAX f32 reference of the same MLP for correctness checks."""
    h = jnp.tanh(obs @ params["w1"].T + params["b1"][:, 0])
    h = jnp.tanh(h @ params["w2"].T + params["b2"][:, 0])
    return h @ params["w3"].T + params["b3"][:, 0]


if __name__ == "__main__":
    OBS_SIZE, ACT_SIZE = 4, 2            # CartPole-v0

    key = jax.random.PRNGKey(0)
    key, k_p, k_t = jax.random.split(key, 3)
    params = init_params(k_p, OBS_SIZE, ACT_SIZE)
    target_params = init_params(k_t, OBS_SIZE, ACT_SIZE)

    # bf16 MXU operands vs f32 reference -> loosened tolerance.
    TOL = dict(atol=5e-2, rtol=5e-2)

    def check(B):
        kk = jax.random.fold_in(key, B)
        k_obs, k_nobs, k_act = jax.random.split(kk, 3)
        obs = jax.random.normal(k_obs, (B, OBS_SIZE), dtype=jnp.float32)
        nobs = jax.random.normal(k_nobs, (B, OBS_SIZE), dtype=jnp.float32)
        act = jax.random.randint(k_act, (B,), 0, ACT_SIZE, dtype=jnp.int32)

        ref = q_forward_ref(obs, params)

        # Q.forward
        out = jax.block_until_ready(q_forward(obs, params))
        assert out.shape == (B, ACT_SIZE)
        assert jnp.allclose(out, ref, **TOL)

        # Q.forward_mask (fused gather)
        out_m = jax.block_until_ready(q_forward_mask(obs, act, params))
        ref_m = jnp.take_along_axis(ref, act[:, None], axis=1)[:, 0]
        assert out_m.shape == (B,)
        assert jnp.allclose(out_m, ref_m, **TOL)

        # Fused training-step targets (single launch for both networks)
        q_sa, q_nmax = jax.block_until_ready(
            q_train_targets(obs, act, nobs, params, target_params))
        ref_nmax = q_forward_ref(nobs, target_params).max(axis=1)
        assert q_sa.shape == (B,) and q_nmax.shape == (B,)
        assert jnp.allclose(q_sa, ref_m, **TOL)
        assert jnp.allclose(q_nmax, ref_nmax, **TOL)

    check(8)      # small batch: single grid step (v5e/v6e-friendly)
    check(512)    # large batch: two 256-wide parallel steps (v7x megacore)

    # TODO(synk): gym environment interaction, replay buffer and the SGD
    # update are host-side Python / optimizer code with no Pallas equivalent;
    # only the Q-network hot path is implemented as kernels.
    print("KERNEL_OK")
</pallas_src>

<mosaic_0001>
module attributes {stable_mosaic.version = 11 : i64} {
  func.func @q_mlp_kernel(%arg0: i32, %arg1: memref<8x4xf32, #tpu.memory_space<vmem>>, %arg2: memref<64x4xf32, #tpu.memory_space<vmem>>, %arg3: memref<64x1xf32, #tpu.memory_space<vmem>>, %arg4: memref<64x64xf32, #tpu.memory_space<vmem>>, %arg5: memref<64x1xf32, #tpu.memory_space<vmem>>, %arg6: memref<2x64xf32, #tpu.memory_space<vmem>>, %arg7: memref<2x1xf32, #tpu.memory_space<vmem>>, %arg8: memref<2x8xf32, #tpu.memory_space<vmem>>) attributes {dimension_semantics = [#tpu.dimension_semantics<parallel>], iteration_bounds = array<i64: 1>, scalar_prefetch = 0 : i64, scratch_operands = 0 : i64, tpu.core_type = #tpu.core_type<tc>, window_params = [{transform_indices = @transform_0, window_bounds = array<i64: 8, 4>}, {pipeline_mode = #tpu.pipeline_mode<synchronous>, transform_indices = @transform_1, window_bounds = array<i64: 64, 4>}, {pipeline_mode = #tpu.pipeline_mode<synchronous>, transform_indices = @transform_2, window_bounds = array<i64: 64, 1>}, {pipeline_mode = #tpu.pipeline_mode<synchronous>, transform_indices = @transform_3, window_bounds = array<i64: 64, 64>}, {pipeline_mode = #tpu.pipeline_mode<synchronous>, transform_indices = @transform_4, window_bounds = array<i64: 64, 1>}, {pipeline_mode = #tpu.pipeline_mode<synchronous>, transform_indices = @transform_5, window_bounds = array<i64: 2, 64>}, {pipeline_mode = #tpu.pipeline_mode<synchronous>, transform_indices = @transform_6, window_bounds = array<i64: 2, 1>}, {transform_indices = @transform_7, window_bounds = array<i64: 2, 8>}]} {
    %c0 = arith.constant 0 : index
    %c0_0 = arith.constant 0 : index
    %0 = vector.load %arg1[%c0, %c0_0] : memref<8x4xf32, #tpu.memory_space<vmem>>, vector<8x4xf32>
    %1 = tpu.transpose %0, [1, 0] : vector<8x4xf32> -> vector<4x8xf32>
    %c0_1 = arith.constant 0 : index
    %c0_2 = arith.constant 0 : index
    %2 = vector.load %arg2[%c0_1, %c0_2] : memref<64x4xf32, #tpu.memory_space<vmem>>, vector<64x4xf32>
    %c0_3 = arith.constant 0 : index
    %c0_4 = arith.constant 0 : index
    %3 = vector.load %arg3[%c0_3, %c0_4] : memref<64x1xf32, #tpu.memory_space<vmem>>, vector<64x1xf32>
    %c0_5 = arith.constant 0 : index
    %c0_6 = arith.constant 0 : index
    %4 = vector.load %arg4[%c0_5, %c0_6] : memref<64x64xf32, #tpu.memory_space<vmem>>, vector<64x64xf32>
    %c0_7 = arith.constant 0 : index
    %c0_8 = arith.constant 0 : index
    %5 = vector.load %arg5[%c0_7, %c0_8] : memref<64x1xf32, #tpu.memory_space<vmem>>, vector<64x1xf32>
    %c0_9 = arith.constant 0 : index
    %c0_10 = arith.constant 0 : index
    %6 = vector.load %arg6[%c0_9, %c0_10] : memref<2x64xf32, #tpu.memory_space<vmem>>, vector<2x64xf32>
    %c0_11 = arith.constant 0 : index
    %c0_12 = arith.constant 0 : index
    %7 = vector.load %arg7[%c0_11, %c0_12] : memref<2x1xf32, #tpu.memory_space<vmem>>, vector<2x1xf32>
    %8 = arith.truncf %2 : vector<64x4xf32> to vector<64x4xbf16>
    %9 = arith.truncf %1 : vector<4x8xf32> to vector<4x8xbf16>
    %cst = arith.constant dense<0.000000e+00> : vector<64x8xf32>
    %10 = tpu.matmul %8, %9, %cst {dimension_numbers = #tpu.dot_dimension_numbers<[1], [0], [0], [1], [0, 0, 1, 1], [], []>} : vector<64x4xbf16>, vector<4x8xbf16>, vector<64x8xf32> -> vector<64x8xf32>
    %11 = vector.broadcast %3 : vector<64x1xf32> to vector<64x8xf32>
    %12 = arith.addf %10, %11 : vector<64x8xf32>
    %13 = math.tanh %12 : vector<64x8xf32>
    %14 = arith.truncf %4 : vector<64x64xf32> to vector<64x64xbf16>
    %15 = arith.truncf %13 : vector<64x8xf32> to vector<64x8xbf16>
    %cst_13 = arith.constant dense<0.000000e+00> : vector<64x8xf32>
    %16 = tpu.matmul %14, %15, %cst_13 {dimension_numbers = #tpu.dot_dimension_numbers<[1], [0], [0], [1], [0, 0, 1, 1], [], []>} : vector<64x64xbf16>, vector<64x8xbf16>, vector<64x8xf32> -> vector<64x8xf32>
    %17 = vector.broadcast %5 : vector<64x1xf32> to vector<64x8xf32>
    %18 = arith.addf %16, %17 : vector<64x8xf32>
    %19 = math.tanh %18 : vector<64x8xf32>
    %20 = arith.truncf %6 : vector<2x64xf32> to vector<2x64xbf16>
    %21 = arith.truncf %19 : vector<64x8xf32> to vector<64x8xbf16>
    %cst_14 = arith.constant dense<0.000000e+00> : vector<2x8xf32>
    %22 = tpu.matmul %20, %21, %cst_14 {dimension_numbers = #tpu.dot_dimension_numbers<[1], [0], [0], [1], [0, 0, 1, 1], [], []>} : vector<2x64xbf16>, vector<64x8xbf16>, vector<2x8xf32> -> vector<2x8xf32>
    %23 = vector.broadcast %7 : vector<2x1xf32> to vector<2x8xf32>
    %24 = arith.addf %22, %23 : vector<2x8xf32>
    %c0_15 = arith.constant 0 : index
    %c0_16 = arith.constant 0 : index
    %25 = vector.load %arg8[%c0_15, %c0_16] : memref<2x8xf32, #tpu.memory_space<vmem>>, vector<2x8xf32>
    tpu.vector_store %arg8[%c0_15, %c0_16], %24 {strides = array<i32>} : memref<2x8xf32, #tpu.memory_space<vmem>>, vector<2x8xf32>,
    return
  }
  func.func @transform_0(%arg0: i32) -> (i32, i32) {
    %c0_i32 = arith.constant 0 : i32
    %c0_i32_0 = arith.constant 0 : i32
    return %arg0, %c0_i32 : i32, i32
  }
  func.func @transform_1(%arg0: i32) -> (i32, i32) {
    %c0_i32 = arith.constant 0 : i32
    %c0_i32_0 = arith.constant 0 : i32
    %c0_i32_1 = arith.constant 0 : i32
    return %c0_i32, %c0_i32_0 : i32, i32
  }
  func.func @transform_2(%arg0: i32) -> (i32, i32) {
    %c0_i32 = arith.constant 0 : i32
    %c0_i32_0 = arith.constant 0 : i32
    %c0_i32_1 = arith.constant 0 : i32
    return %c0_i32, %c0_i32_0 : i32, i32
  }
  func.func @transform_3(%arg0: i32) -> (i32, i32) {
    %c0_i32 = arith.constant 0 : i32
    %c0_i32_0 = arith.constant 0 : i32
    %c0_i32_1 = arith.constant 0 : i32
    return %c0_i32, %c0_i32_0 : i32, i32
  }
  func.func @transform_4(%arg0: i32) -> (i32, i32) {
    %c0_i32 = arith.constant 0 : i32
    %c0_i32_0 = arith.constant 0 : i32
    %c0_i32_1 = arith.constant 0 : i32
    return %c0_i32, %c0_i32_0 : i32, i32
  }
  func.func @transform_5(%arg0: i32) -> (i32, i32) {
    %c0_i32 = arith.constant 0 : i32
    %c0_i32_0 = arith.constant 0 : i32
    %c0_i32_1 = arith.constant 0 : i32
    return %c0_i32, %c0_i32_0 : i32, i32
  }
  func.func @transform_6(%arg0: i32) -> (i32, i32) {
    %c0_i32 = arith.constant 0 : i32
    %c0_i32_0 = arith.constant 0 : i32
    %c0_i32_1 = arith.constant 0 : i32
    return %c0_i32, %c0_i32_0 : i32, i32
  }
  func.func @transform_7(%arg0: i32) -> (i32, i32) {
    %c0_i32 = arith.constant 0 : i32
    %c0_i32_0 = arith.constant 0 : i32
    return %c0_i32, %arg0 : i32, i32
  }
}

</mosaic_0001>

<bundles_post_ra>
// kernel: tpu_custom_call.1
= control target key start
LH: loop header
LB: loop body
LE: loop exit
PB: predicated region body
PF: predicated region fallthrough
CT: control target
= control target key end

     0   :  { %vm140_vm0 = vcmask 31744   ;;  %s720_s0 = inlined_call_operand.vmem [shape: f32[8,4], index: 0, kind: input, shape index: {}]   ;;  %s721_s1 = inlined_call_operand.vmem [shape: f32[64,4], index: 1, kind: input, shape index: {}]   ;;  %s722_s2 = inlined_call_operand.vmem [shape: f32[64,1], index: 2, kind: input, shape index: {}]   ;;  %s723_s3 = inlined_call_operand.vmem [shape: f32[64,64], index: 3, kind: input, shape index: {}]   ;;  %s724_s4 = inlined_call_operand.vmem [shape: f32[64,1], index: 4, kind: input, shape index: {}]   ;;  %s725_s5 = inlined_call_operand.vmem [shape: f32[2,64], index: 5, kind: input, shape index: {}]   ;;  %s726_s6 = inlined_call_operand.vmem [shape: f32[2,1], index: 6, kind: input, shape index: {}]   ;;  %s727_s7 = inlined_call_operand.hbm [shape: f32[2,8], index: 7, kind: output, shape index: {}]  }
   0x1   :  { %v28_v0 = vld [vmem:[%s720_s0] sm:$0xff]  ;;  %v62_v2 = vld [vmem:[%s721_s1 + $0x8] sm:$0xff] }
   0x2   :  { %v61_v1 = vld [vmem:[%s721_s1] sm:$0xff]  ;;  %29 = vxpose.xlu0.b32.start.end [1/1] (short) (narrow) %v28_v0, 8 }
   0x3   :  { %v95_v3 = vpack.c.bf16 %v62_v2, %v61_v1 }
   0x4   :  { %12 = vsyncpa [#allocation3], 0  ;;  %v76_v4 = vld [vmem:[%s722_s2 + $0x38] sm:$0xff]  ;;  %v559_v5 = vmov 0   ;;  %v73_v6 = vld [vmem:[%s722_s2 + $0x20] sm:$0xff]  ;;  %vm153_vm1 = vcmask 1041408  }
   0x5   :  { %462 = vmatprep.mubr.msk.bf16.mxu0 %vm140_vm0, %v95_v3  ;;  %504 = vset.pattern.permute.xlu1 %v559_v5  ;;  %v74_v7 = vld [vmem:[%s722_s2 + $0x28] sm:$0xff]  ;;  %v71_v8 = vld [vmem:[%s722_s2 + $0x10] sm:$0xff]  ;;  %v72_v9 = vld [vmem:[%s722_s2 + $0x18] sm:$0xff]  ;;  %vm278_vm2 = vcmask 523264   ;;  %vm561_vm3 = vmmov 0   ;;  %s562_s16 = smov [#allocation2]  }
   0x6   :  { %137 = vperm.xlu1 %504, %v76_v4   ;;  %v69_v10 = vld [vmem:[%s722_s2] sm:$0xff]  ;;  %v70_v11 = vld [vmem:[%s722_s2 + $0x8] sm:$0xff]  ;;  %v91_v12 = vld [vmem:[%s724_s4 + $0x30] sm:$0xff]  ;;  %s425_s17 = sshll.u32 %s562_s16, 4  ;;  %vm417_vm4 = vcmask 58368   ;;  %s426_s17 = int_to_ptr.vmem [resolvable:$true] %s425_s17 }
   0x7   :  { %v75_v13 = vld [vmem:[%s722_s2 + $0x30] sm:$0xff]  ;;  %v92_v14 = vld [vmem:[%s724_s4 + $0x38] sm:$0xff]  ;;  %v89_v16 = vld [vmem:[%s724_s4 + $0x20] sm:$0xff]  ;;  %s537_s18 = scalar_lea.vmem %s426_s17, 32  ;;  %p542_p1 = scmp.lt.s32.totalorder %s426_s17, %s426_s17 }
   0x8   :  { %v88_v15 = vld [vmem:[%s724_s4 + $0x18] sm:$0xff]  ;;  %v86_v17 = vld [vmem:[%s724_s4 + $0x8] sm:$0xff]  ;;  %v87_v19 = vld [vmem:[%s724_s4 + $0x10] sm:$0xff]  ;;  %p538_p0 = scmp.ne.s32.totalorder %s426_s17, %s537_s18  ;;  %p543_p2 = scmp.lt.s32.totalorder %s537_s18, %s537_s18 }
   0x9   :  { %v90_v18 = vld [vmem:[%s724_s4 + $0x28] sm:$0xff]  ;;  %v85_v20 = vld [vmem:[%s724_s4] sm:$0xff]  ;;  %v63_v23 = vld [vmem:[%s721_s1 + $0x10] sm:$0xff] }
   0xa   :  { %122 = vperm.xlu1 %504, %v73_v6   ;;  %v94_v21 = vld [vmem:[%s726_s6] sm:$0x3]  ;;  %v64_v24 = vld [vmem:[%s721_s1 + $0x18] sm:$0xff]  ;;  %v66_v27 = vld [vmem:[%s721_s1 + $0x28] sm:$0xff]  ;;  %p544_p3 = por %p543_p2, %p542_p1 }
   0xb   :  { %v65_v26 = vld [vmem:[%s721_s1 + $0x20] sm:$0xff]  ;;  %v96_v29 = vpack.c.bf16 %v64_v24, %v63_v23  ;;  %v67_v31 = vld [vmem:[%s721_s1 + $0x30] sm:$0xff]  ;;  %v68_v32 = vld [vmem:[%s721_s1 + $0x38] sm:$0xff] }
   0xc   :  { %v97_v30 = vpack.c.bf16 %v66_v27, %v65_v26  ;;  %v98_v33 = vpack.c.bf16 %v68_v32, %v67_v31  ;;  %v77_v34 = vld [vmem:[%s723_s3] sm:$0xff]  ;;  %v78_v35 = vld [vmem:[%s723_s3 + $0x8] sm:$0xff]  ;;  %p545_p4 = pnand %p544_p3, %p538_p0 }
   0xd   :  { %v230_v36 = vpack.c.bf16 %v78_v35, %v77_v34 }
   0xe   :  { %127 = vperm.xlu1 %504, %v74_v7  }
   0xf   :  { %478 = vmatprep.mubr.msk.bf16.mxu1 %vm278_vm2, %v230_v36 }
  0x12   :  { %112 = vperm.xlu1 %504, %v71_v8  }
  0x16   :  { %117 = vperm.xlu1 %504, %v72_v9   ;;  %v79_v9 = vld [vmem:[%s723_s3 + $0x10] sm:$0xff] }
  0x1a   :  { %102 = vperm.xlu1 %504, %v69_v10   ;;  %v80_v10 = vld [vmem:[%s723_s3 + $0x18] sm:$0xff] }
  0x1e   :  { %107 = vperm.xlu1 %504, %v70_v11   ;;  %v81_v11 = vld [vmem:[%s723_s3 + $0x20] sm:$0xff] }
  0x22   :  { %270 = vperm.xlu1 %504, %v91_v12   ;;  %v82_v12 = vld [vmem:[%s723_s3 + $0x28] sm:$0xff] }
  0x26   :  { %275 = vperm.xlu1 %504, %v92_v14   ;;  %v232_v14 = vpack.c.bf16 %v82_v12, %v81_v11 }
  0x2a   :  { %260 = vperm.xlu1 %504, %v89_v16   ;;  %v84_v16 = vld [vmem:[%s723_s3 + $0x38] sm:$0xff] }
  0x2b   :  { %503 = vset.pattern.permute.xlu0 %v559_v5 }
  0x2c   :  { %132 = vperm.xlu0 %503, %v75_v13   ;;  %v231_v13 = vpack.c.bf16 %v80_v10, %v79_v9 }
  0x2e   :  { %265 = vperm.xlu1 %504, %v90_v18   ;;  %v560_v18 = vmov 0.0  }
  0x30   :  { %255 = vperm.xlu0 %503, %v88_v15   ;;  %v83_v15 = vld [vmem:[%s723_s3 + $0x30] sm:$0xff] }
  0x32   :  { %250 = vperm.xlu1 %504, %v87_v19  }
  0x34   :  { %245 = vperm.xlu0 %503, %v86_v17   ;;  %v233_v17 = vpack.c.bf16 %v84_v16, %v83_v15 }
  0x36   :  { %240 = vperm.xlu1 %504, %v85_v20  }
  0x3a   :  { %371 = vperm.xlu1 %504, %v94_v21  }
  0x7e   :  { %v45_v22 = vpop.trf.xlu0 }
  0x7f   :  { %v99_v25 = vpack.c.bf16 %v45_v22, %v45_v22 }
  0x81   :  { %498 = vmatprep.subr.msk.bf16.mxu0 %vm153_vm1, %v99_v25  ;;  %v155_v28 = vsel %vm153_vm1, %v99_v25, 0  ;;  %v138_v37 = vpop.permute.xlu1 %137 }
  0x82   :  { %461 = vmatpush3.bf16.msra.mxu0 %v155_v28 }
  0x83   :  { %486 = vmatprep.subr.bf16.mxu0 %v560_v18 }
  0x85   :  { %463 = vmatmul.mubr.msk.bf16.vlgmr.msra.gmra.mxu0 %vm140_vm0, %v96_v29  ;;  %v123_v38 = vpop.permute.xlu1 %122 }
  0x86   :  { %466 = vmatprep.mubr.msk.bf16.mxu0 %vm140_vm0, %v97_v30 }
  0x89   :  { %v128_v39 = vpop.permute.xlu1 %127 }
  0x8d   :  { %467 = vmatmul.mubr.msk.bf16.gmra.mxu0 %vm140_vm0, %v98_v33  ;;  %v113_v40 = vpop.permute.xlu1 %112 }
  0x8e   :  { %494 = vmatprep.mubr.msk.bf16.mxu0 %vm561_vm3, %v560_v18 }
  0x91   :  { %v118_v44 = vpop.permute.xlu1 %117 }
  0x95   :  { %v103_v50 = vpop.permute.xlu1 %102 }
  0x99   :  { %v108_v58 = vpop.permute.xlu1 %107 }
  0x9d   :  { %v271_v19 = vpop.permute.xlu1 %270 }
  0xa1   :  { %v276_v20 = vpop.permute.xlu1 %275 }
  0xa5   :  { %v261_v23 = vpop.permute.xlu1 %260 }
  0xa7   :  { %v133_v47 = vpop.permute.xlu0 %132 }
  0xa9   :  { %v266_v27 = vpop.permute.xlu1 %265 }
  0xab   :  { %v256_v32 = vpop.permute.xlu0 %255 }
  0xad   :  { %v251_v36 = vpop.permute.xlu1 %250 }
 0x145   :  { %v464_v41 = vpop.f32.mrf.mxu0 }
 0x146   :  { %v200_v57 = vadd.f32 %v464_v41, %v113_v40  ;;  %v241_v41 = vpop.permute.xlu1 %240 }
 0x147   :  { %v191_v42 = vpop.f32.mrf.mxu0 }
 0x148   :  { %v192_v60 = vadd.f32 %v191_v42, %v103_v50 }
 0x149   :  { %v465_v43 = vpop.f32.mrf.mxu0 }
 0x14a   :  { %v203_v55 = vadd.f32 %v465_v43, %v118_v44 }
 0x14b   :  { %v194_v45 = vpop.f32.mrf.mxu0 }
 0x14c   :  { %v195_v59 = vadd.f32 %v194_v45, %v108_v58 }
 0x14d   :  { %v468_v46 = vpop.f32.mrf.mxu0 }
 0x14e   :  { %v216_v48 = vadd.f32 %v468_v46, %v133_v47 }
 0x14f   :  { %v207_v49 = vpop.f32.mrf.mxu0 }
 0x150   :  { %v208_v51 = vadd.f32 %v207_v49, %v123_v38  ;;  %505 = vtanh.f32 %v216_v48 }
 0x151   :  { %v469_v52 = vpop.f32.mrf.mxu0 }
 0x152   :  { %v219_v53 = vadd.f32 %v469_v52, %v138_v37 }
 0x153   :  { %v210_v54 = vpop.f32.mrf.mxu0 }
 0x154   :  { %507 = vtanh.f32 %v219_v53  ;;  %v211_v56 = vadd.f32 %v210_v54, %v128_v39  ;;  %v246_v39 = vpop.permute.xlu0 %245  ;;  %v93_v53 = vld [vmem:[%s725_s5] sm:$0x3] }
 0x155   :  { %509 = vtanh.f32 %v208_v51 }
 0x156   :  { %511 = vtanh.f32 %v211_v56  ;;  %v364_v56 = vpack.c.bf16 %v93_v53, %v93_v53 }
 0x157   :  { %513 = vtanh.f32 %v203_v55 }
 0x158   :  { %515 = vtanh.f32 %v200_v57  ;;  %v372_v57 = vpop.permute.xlu1 %371 }
 0x159   :  { %517 = vtanh.f32 %v195_v59 }
 0x15a   :  { %519 = vtanh.f32 %v192_v60 }
 0x15d   :  { %v506_v61 = vpop.eup %505 }
 0x161   :  { %v508_v62 = vpop.eup %507 }
 0x162   :  { %v510_v63 = vpop.eup %509  ;;  %v237_v0 = vpack.c.bf16 %v508_v62, %v506_v61 }
 0x163   :  { %v512_v1 = vpop.eup %511 }
 0x164   :  { %470 = vmatprep.subr.bf16.mxu1 %v237_v0  ;;  %v236_v2 = vpack.c.bf16 %v512_v1, %v510_v63  ;;  %v514_v3 = vpop.eup %513 }
 0x165   :  { %471 = vmatpush3.bf16.msra.mxu1 %v237_v0  ;;  %v516_v4 = vpop.eup %515 }
 0x166   :  { %472 = vmatprep.subr.bf16.mxu1 %v236_v2  ;;  %v235_v5 = vpack.c.bf16 %v514_v3, %v516_v4  ;;  %v518_v6 = vpop.eup %517 }
 0x167   :  { %v520_v7 = vpop.eup %519 }
 0x168   :  { %v234_v8 = vpack.c.bf16 %v518_v6, %v520_v7 }
 0x169   :  { %473 = vmatpush3.bf16.msra.mxu1 %v236_v2 }
 0x16a   :  { %474 = vmatprep.subr.bf16.mxu1 %v235_v5 }
 0x16d   :  { %475 = vmatpush3.bf16.msra.mxu1 %v235_v5 }
 0x16e   :  { %476 = vmatprep.subr.bf16.mxu1 %v234_v8 }
 0x171   :  { %477 = vmatpush3.bf16.msra.mxu1 %v234_v8 }
 0x174   :  { %479 = vmatmul.mubr.msk.bf16.vlgmr.msra.gmra.mxu1 %vm278_vm2, %v231_v13 }
 0x175   :  { %482 = vmatprep.mubr.msk.bf16.mxu1 %vm278_vm2, %v232_v14 }
 0x17c   :  { %483 = vmatmul.mubr.msk.bf16.gmra.mxu1 %vm278_vm2, %v233_v17 }
 0x234   :  { %v480_v21 = vpop.f32.mrf.mxu1 }
 0x235   :  { %v334_v38 = vadd.f32 %v480_v21, %v251_v36 }
 0x236   :  { %v325_v22 = vpop.f32.mrf.mxu1 }
 0x237   :  { %v326_v42 = vadd.f32 %v325_v22, %v241_v41 }
 0x238   :  { %v481_v24 = vpop.f32.mrf.mxu1 }
 0x239   :  { %v337_v37 = vadd.f32 %v481_v24, %v256_v32 }
 0x23a   :  { %v328_v25 = vpop.f32.mrf.mxu1 }
 0x23b   :  { %v329_v40 = vadd.f32 %v328_v25, %v246_v39 }
 0x23c   :  { %v484_v26 = vpop.f32.mrf.mxu1 }
 0x23d   :  { %v350_v28 = vadd.f32 %v484_v26, %v271_v19 }
 0x23e   :  { %v341_v29 = vpop.f32.mrf.mxu1 }
 0x23f   :  { %521 = vtanh.f32 %v350_v28  ;;  %v342_v34 = vadd.f32 %v341_v29, %v261_v23 }
 0x240   :  { %v485_v30 = vpop.f32.mrf.mxu1 }
 0x241   :  { %v353_v31 = vadd.f32 %v485_v30, %v276_v20 }
 0x242   :  { %v344_v33 = vpop.f32.mrf.mxu1 }
 0x243   :  { %523 = vtanh.f32 %v353_v31  ;;  %v345_v35 = vadd.f32 %v344_v33, %v266_v27 }
 0x245   :  { %525 = vtanh.f32 %v345_v35 }
 0x246   :  { %527 = vtanh.f32 %v342_v34 }
 0x247   :  { %529 = vtanh.f32 %v337_v37 }
 0x248   :  { %531 = vtanh.f32 %v334_v38 }
 0x249   :  { %533 = vtanh.f32 %v329_v40 }
 0x24a   :  { %535 = vtanh.f32 %v326_v42 }
 0x24c   :  { %v522_v43 = vpop.eup %521 }
 0x250   :  { %v524_v44 = vpop.eup %523 }
 0x251   :  { %v368_v45 = vpack.c.bf16 %v524_v44, %v522_v43 }
 0x252   :  { %v526_v46 = vpop.eup %525 }
 0x253   :  { %487 = vmatpush3.bf16.msra.mxu0 %v368_v45  ;;  %v528_v47 = vpop.eup %527 }
 0x254   :  { %488 = vmatprep.subr.bf16.mxu0 %v560_v18  ;;  %v367_v48 = vpack.c.bf16 %v526_v46, %v528_v47  ;;  %v530_v49 = vpop.eup %529 }
 0x255   :  { %v532_v50 = vpop.eup %531 }
 0x256   :  { %v366_v51 = vpack.c.bf16 %v530_v49, %v532_v50  ;;  %v534_v52 = vpop.eup %533 }
 0x257   :  { %489 = vmatpush3.bf16.msra.mxu0 %v367_v48  ;;  %v536_v54 = vpop.eup %535 }
 0x258   :  { %490 = vmatprep.subr.bf16.mxu0 %v560_v18  ;;  %v365_v55 = vpack.c.bf16 %v534_v52, %v536_v54 }
 0x25b   :  { %491 = vmatpush3.bf16.msra.mxu0 %v366_v51 }
 0x25c   :  { %492 = vmatprep.subr.bf16.mxu0 %v560_v18 }
 0x25f   :  { %493 = vmatpush3.bf16.msra.mxu0 %v365_v55 }
 0x262   :  { %495 = vmatmul.mubr.msk.bf16.vlgmr.msra.gmra.mxu0 %vm278_vm2, %v364_v56 }
 0x322   :  { %v411_v58 = vpop.f32.mrf.mxu0 }
 0x323   :  { %v412_v59 = vadd.f32 %v411_v58, %v372_v57 }
 0x324   :  { %v496_v60 = vpop.f32.mrf.mxu0 }
 0x325   :  { %418 = vst.msk [vmem:[#allocation2] sm:$0x3] %vm417_vm4, %v412_v59 }
 0x326   :  { %v414_v61 = vpop.f32.mrf.mxu0 }
 0x327   :  { %548 = shalt.err (!%p545_p4)
}
 0x328   :  { %428 = dma.vmem_to_hbm [thread:$0]  %s426_s17, 32, %s727_s7, [#allocation3]   ;;  %v497_v62 = vpop.f32.mrf.mxu0 }
 0x329   :  { %557 = dma.done.wait [#allocation3], 32  }
 0x32a   :  { %558 = vsyncadd [#allocation3], 4294967264 }
 0x32b   :  { %432 = vsyncpa [#allocation3], 1 }

</bundles_post_ra>
